<compile_context>
chip_gen: v5e
topology: v5e:2x2
jax: 0.10.0
libtpu: 0.0.40
codegen_flags: <defaults>
</compile_context>

<pallas_src>
import functools
import math

import jax
import jax.numpy as jnp
from jax.experimental import pallas as pl
from jax.experimental.pallas import tpu as pltpu

_HALF_LOG_2PI = 0.5 * math.log(2.0 * math.pi)


def _round_up(x, m):
    return ((x + m - 1) // m) * m


def actor_kernel(
    x_ref,        # (S, bt)   state tile, batch on lanes
    eps_ref,      # (A, bt)   N(0,1) noise tile, batch on lanes
    w1_ref,       # (H, S)    torch-layout weights
    w2_ref,       # (H, H)
    w3_ref,       # (H, H)
    w4_ref,       # (A, H)
    b123_ref,     # (H, 3)    packed biases of layers 1..3 (columns)
    tail_ref,     # (A, 2)    column 0 = b4, column 1 = log_std (unclamped)
    act_ref,      # (A, bt)   output: clamped action, batch on lanes
    lp_ref,       # (1, bt)   output: log_prob row, batch on lanes
    *,
    min_log_std,
    max_log_std,
    min_action,
    max_action,
):
    x = x_ref[...]
    b = b123_ref[...]

    h = jnp.maximum(
        jnp.dot(w1_ref[...], x, preferred_element_type=jnp.float32) + b[:, 0:1], 0.0)
    h = jnp.maximum(
        jnp.dot(w2_ref[...], h, preferred_element_type=jnp.float32) + b[:, 1:2], 0.0)
    h = jnp.maximum(
        jnp.dot(w3_ref[...], h, preferred_element_type=jnp.float32) + b[:, 2:3], 0.0)

    tail = tail_ref[...]
    b4_col = tail[:, 0:1]                                        # (A, 1)
    log_std = jnp.clip(tail[:, 1:2], min_log_std, max_log_std)   # (A, 1)
    std = jnp.exp(log_std)                                       # (A, 1)  EUP
    inv_std = jnp.exp(-log_std)                                  # (A, 1)  EUP, no divide

    mean = jnp.tanh(
        jnp.dot(w4_ref[...], h, preferred_element_type=jnp.float32) + b4_col)  # (A, bt)

    action = jnp.clip(mean + std * eps_ref[...], min_action, max_action)       # rsample
    z = (action - mean) * inv_std                                               # (A, bt)

    # Batch-independent normalization term reduced once (scalar), not per lane.
    A = tail.shape[0]
    const = jnp.sum(log_std) + A * _HALF_LOG_2PI

    act_ref[...] = action.astype(act_ref.dtype)
    lp_ref[...] = (-0.5 * jnp.sum(z * z, axis=0, keepdims=True) - const).astype(
        lp_ref.dtype)


def actor_forward(
    state,          # (B, S)
    eps_t,          # (A, B)  standard-normal noise, batch on the last axis
    params,
    *,
    batch_tile=512,
    min_log_std=-5.0,
    max_log_std=2.0,
    min_action=-1.0,
    max_action=1.0,
):
    """Actor.forward: returns (action (B, A), log_prob (B, 1))."""
    state = state.astype(jnp.float32)
    eps_t = eps_t.astype(jnp.float32)
    B, S = state.shape
    A, H = params["w4"].shape
    assert eps_t.shape == (A, B)

    # Batch tiling: big lane-dense tiles; pad ragged batches with zero columns.
    if B <= batch_tile:
        bt = _round_up(B, 8)
    else:
        assert batch_tile % 128 == 0, "batch_tile must be a multiple of 128"
        bt = batch_tile
    b_pad = _round_up(B, bt)
    grid = (b_pad // bt,)

    x_t = state.T                               # (S, B) feature-major
    if b_pad != B:
        x_t = jnp.pad(x_t, ((0, 0), (0, b_pad - B)))
        eps_t = jnp.pad(eps_t, ((0, 0), (0, b_pad - B)))

    def col_tile_spec(rows):                    # tiled along batch (lane) axis
        return pl.BlockSpec((rows, bt), lambda i: (0, i))

    def full_spec(r, c):                        # replicated parameter (VMEM-resident)
        return pl.BlockSpec((r, c), lambda i: (0, 0))

    in_specs = [
        col_tile_spec(S),                       # x_t
        col_tile_spec(A),                       # eps_t
        full_spec(H, S),                        # w1
        full_spec(H, H),                        # w2
        full_spec(H, H),                        # w3
        full_spec(A, H),                        # w4
        full_spec(H, 3),                        # packed biases
        full_spec(A, 2),                        # b4 / log_std
    ]
    out_specs = (
        pl.BlockSpec((A, bt), lambda i: (0, i)),   # action (lane-dense)
        pl.BlockSpec((1, bt), lambda i: (0, i)),   # log_prob row (lane-dense)
    )
    out_shape = (
        jax.ShapeDtypeStruct((A, b_pad), jnp.float32),
        jax.ShapeDtypeStruct((1, b_pad), jnp.float32),
    )

    kernel = functools.partial(
        actor_kernel,
        min_log_std=min_log_std,
        max_log_std=max_log_std,
        min_action=min_action,
        max_action=max_action,
    )

    act_t, lp_row = pl.pallas_call(
        kernel,
        out_shape=out_shape,
        grid_spec=pltpu.PrefetchScalarGridSpec(
            num_scalar_prefetch=0,
            grid=grid,
            in_specs=in_specs,
            out_specs=out_specs,
        ),
        compiler_params=pltpu.CompilerParams(
            dimension_semantics=("parallel",),
        ),
    )(
        x_t, eps_t,
        params["w1"], params["w2"], params["w3"], params["w4"],
        params["b123"], params["tail"],
    )

    action = act_t[:, :B].T                     # (B, A)
    log_prob = lp_row[:, :B].T                  # (B, 1)
    return action, log_prob


def init_actor_params(key, state_dim, action_dim, hidden_dim=256):
    """Mirror torch defaults: Linear weight/bias ~ U(-1/sqrt(fan_in), +1/sqrt(fan_in)),
    log_std initialized to zeros. Weights kept in torch (out, in) layout."""
    keys = jax.random.split(key, 8)

    def linear(kw, kb, fan_in, fan_out):
        bound = 1.0 / math.sqrt(fan_in)
        w = jax.random.uniform(kw, (fan_out, fan_in), jnp.float32, -bound, bound)
        b = jax.random.uniform(kb, (fan_out,), jnp.float32, -bound, bound)
        return w, b

    w1, b1 = linear(keys[0], keys[1], state_dim, hidden_dim)
    w2, b2 = linear(keys[2], keys[3], hidden_dim, hidden_dim)
    w3, b3 = linear(keys[4], keys[5], hidden_dim, hidden_dim)
    w4, b4 = linear(keys[6], keys[7], hidden_dim, action_dim)
    log_std = jnp.zeros((action_dim,), jnp.float32)

    return {
        "w1": w1, "w2": w2, "w3": w3, "w4": w4,
        "b123": jnp.stack([b1, b2, b3], axis=1),     # (H, 3)
        "tail": jnp.stack([b4, log_std], axis=1),    # (A, 2)
    }


def actor_forward_ref(
    state, eps_t, params, *,
    min_log_std=-5.0, max_log_std=2.0, min_action=-1.0, max_action=1.0,
):
    """Pure-JAX reference (standard batch-major math) for correctness checking."""
    x = state.astype(jnp.float32)
    b123 = params["b123"]
    h = jnp.maximum(x @ params["w1"].T + b123[:, 0], 0.0)
    h = jnp.maximum(h @ params["w2"].T + b123[:, 1], 0.0)
    h = jnp.maximum(h @ params["w3"].T + b123[:, 2], 0.0)
    mean = jnp.tanh(h @ params["w4"].T + params["tail"][:, 0])
    log_std = jnp.clip(params["tail"][:, 1], min_log_std, max_log_std)
    std = jnp.exp(log_std)
    action = jnp.clip(mean + std * eps_t.astype(jnp.float32).T, min_action, max_action)
    z = (action - mean) / std
    lp = -0.5 * z * z - log_std - _HALF_LOG_2PI
    return action, jnp.sum(lp, axis=-1, keepdims=True)


if __name__ == "__main__":
    key = jax.random.PRNGKey(0)
    k_state, k_eps, k_params = jax.random.split(key, 3)

    B, STATE_DIM, ACTION_DIM, HIDDEN = 8, 12, 6, 32

    state = jax.random.normal(k_state, (B, STATE_DIM), jnp.float32)
    eps_t = jax.random.normal(k_eps, (ACTION_DIM, B), jnp.float32)   # reparam noise
    params = init_actor_params(k_params, STATE_DIM, ACTION_DIM, HIDDEN)

    action, log_prob = actor_forward(state, eps_t, params)
    action = jax.block_until_ready(action)
    log_prob = jax.block_until_ready(log_prob)

    action_ref, log_prob_ref = actor_forward_ref(state, eps_t, params)

    assert action.shape == (B, ACTION_DIM)
    assert log_prob.shape == (B, 1)
    assert jnp.allclose(action, action_ref, atol=1e-4, rtol=1e-4), (action, action_ref)
    assert jnp.allclose(log_prob, log_prob_ref, atol=1e-4, rtol=1e-4), (log_prob, log_prob_ref)

    print("KERNEL_OK")
</pallas_src>

<mosaic_0001>
module attributes {stable_mosaic.version = 11 : i64} {
  func.func @actor_kernel(%arg0: i32, %arg1: memref<12x8xf32, #tpu.memory_space<vmem>>, %arg2: memref<6x8xf32, #tpu.memory_space<vmem>>, %arg3: memref<32x12xf32, #tpu.memory_space<vmem>>, %arg4: memref<32x32xf32, #tpu.memory_space<vmem>>, %arg5: memref<32x32xf32, #tpu.memory_space<vmem>>, %arg6: memref<6x32xf32, #tpu.memory_space<vmem>>, %arg7: memref<32x3xf32, #tpu.memory_space<vmem>>, %arg8: memref<6x2xf32, #tpu.memory_space<vmem>>, %arg9: memref<6x8xf32, #tpu.memory_space<vmem>>, %arg10: memref<1x8xf32, #tpu.memory_space<vmem>>) attributes {dimension_semantics = [#tpu.dimension_semantics<parallel>], iteration_bounds = array<i64: 1>, scalar_prefetch = 0 : i64, scratch_operands = 0 : i64, tpu.core_type = #tpu.core_type<tc>, window_params = [{transform_indices = @transform_0, window_bounds = array<i64: 12, 8>}, {transform_indices = @transform_1, window_bounds = array<i64: 6, 8>}, {pipeline_mode = #tpu.pipeline_mode<synchronous>, transform_indices = @transform_2, window_bounds = array<i64: 32, 12>}, {pipeline_mode = #tpu.pipeline_mode<synchronous>, transform_indices = @transform_3, window_bounds = array<i64: 32, 32>}, {pipeline_mode = #tpu.pipeline_mode<synchronous>, transform_indices = @transform_4, window_bounds = array<i64: 32, 32>}, {pipeline_mode = #tpu.pipeline_mode<synchronous>, transform_indices = @transform_5, window_bounds = array<i64: 6, 32>}, {pipeline_mode = #tpu.pipeline_mode<synchronous>, transform_indices = @transform_6, window_bounds = array<i64: 32, 3>}, {pipeline_mode = #tpu.pipeline_mode<synchronous>, transform_indices = @transform_7, window_bounds = array<i64: 6, 2>}, {transform_indices = @transform_8, window_bounds = array<i64: 6, 8>}, {transform_indices = @transform_9, window_bounds = array<i64: 1, 8>}]} {
    %c0 = arith.constant 0 : index
    %c0_0 = arith.constant 0 : index
    %0 = vector.load %arg1[%c0, %c0_0] : memref<12x8xf32, #tpu.memory_space<vmem>>, vector<12x8xf32>
    %c0_1 = arith.constant 0 : index
    %c0_2 = arith.constant 0 : index
    %1 = vector.load %arg7[%c0_1, %c0_2] : memref<32x3xf32, #tpu.memory_space<vmem>>, vector<32x3xf32>
    %c0_3 = arith.constant 0 : index
    %c0_4 = arith.constant 0 : index
    %2 = vector.load %arg3[%c0_3, %c0_4] : memref<32x12xf32, #tpu.memory_space<vmem>>, vector<32x12xf32>
    %cst = arith.constant dense<0.000000e+00> : vector<32x8xf32>
    %3 = tpu.matmul %2, %0, %cst {dimension_numbers = #tpu.dot_dimension_numbers<[1], [0], [0], [1], [0, 0, 1, 1], [], []>} : vector<32x12xf32>, vector<12x8xf32>, vector<32x8xf32> -> vector<32x8xf32>
    %4 = vector.extract_strided_slice %1 {offsets = [0, 0], sizes = [32, 1], strides = [1, 1]} : vector<32x3xf32> to vector<32x1xf32>
    %5 = vector.broadcast %4 : vector<32x1xf32> to vector<32x8xf32>
    %6 = arith.addf %3, %5 : vector<32x8xf32>
    %cst_5 = arith.constant 0.000000e+00 : f32
    %7 = vector.broadcast %cst_5 : f32 to vector<32x8xf32>
    %8 = arith.maximumf %6, %7 : vector<32x8xf32>
    %c0_6 = arith.constant 0 : index
    %c0_7 = arith.constant 0 : index
    %9 = vector.load %arg4[%c0_6, %c0_7] : memref<32x32xf32, #tpu.memory_space<vmem>>, vector<32x32xf32>
    %cst_8 = arith.constant dense<0.000000e+00> : vector<32x8xf32>
    %10 = tpu.matmul %9, %8, %cst_8 {dimension_numbers = #tpu.dot_dimension_numbers<[1], [0], [0], [1], [0, 0, 1, 1], [], []>} : vector<32x32xf32>, vector<32x8xf32>, vector<32x8xf32> -> vector<32x8xf32>
    %11 = vector.extract_strided_slice %1 {offsets = [0, 1], sizes = [32, 1], strides = [1, 1]} : vector<32x3xf32> to vector<32x1xf32>
    %12 = vector.broadcast %11 : vector<32x1xf32> to vector<32x8xf32>
    %13 = arith.addf %10, %12 : vector<32x8xf32>
    %cst_9 = arith.constant 0.000000e+00 : f32
    %14 = vector.broadcast %cst_9 : f32 to vector<32x8xf32>
    %15 = arith.maximumf %13, %14 : vector<32x8xf32>
    %c0_10 = arith.constant 0 : index
    %c0_11 = arith.constant 0 : index
    %16 = vector.load %arg5[%c0_10, %c0_11] : memref<32x32xf32, #tpu.memory_space<vmem>>, vector<32x32xf32>
    %cst_12 = arith.constant dense<0.000000e+00> : vector<32x8xf32>
    %17 = tpu.matmul %16, %15, %cst_12 {dimension_numbers = #tpu.dot_dimension_numbers<[1], [0], [0], [1], [0, 0, 1, 1], [], []>} : vector<32x32xf32>, vector<32x8xf32>, vector<32x8xf32> -> vector<32x8xf32>
    %18 = vector.extract_strided_slice %1 {offsets = [0, 2], sizes = [32, 1], strides = [1, 1]} : vector<32x3xf32> to vector<32x1xf32>
    %19 = vector.broadcast %18 : vector<32x1xf32> to vector<32x8xf32>
    %20 = arith.addf %17, %19 : vector<32x8xf32>
    %cst_13 = arith.constant 0.000000e+00 : f32
    %21 = vector.broadcast %cst_13 : f32 to vector<32x8xf32>
    %22 = arith.maximumf %20, %21 : vector<32x8xf32>
    %c0_14 = arith.constant 0 : index
    %c0_15 = arith.constant 0 : index
    %23 = vector.load %arg8[%c0_14, %c0_15] : memref<6x2xf32, #tpu.memory_space<vmem>>, vector<6x2xf32>
    %24 = vector.extract_strided_slice %23 {offsets = [0, 0], sizes = [6, 1], strides = [1, 1]} : vector<6x2xf32> to vector<6x1xf32>
    %25 = vector.extract_strided_slice %23 {offsets = [0, 1], sizes = [6, 1], strides = [1, 1]} : vector<6x2xf32> to vector<6x1xf32>
    %cst_16 = arith.constant -5.000000e+00 : f32
    %cst_17 = arith.constant 2.000000e+00 : f32
    %26 = vector.broadcast %cst_16 : f32 to vector<6x1xf32>
    %27 = arith.maximumf %26, %25 : vector<6x1xf32>
    %28 = vector.broadcast %cst_17 : f32 to vector<6x1xf32>
    %29 = arith.minimumf %28, %27 : vector<6x1xf32>
    %30 = math.exp %29 : vector<6x1xf32>
    %cst_18 = arith.constant 0.000000e+00 : f32
    %31 = vector.broadcast %cst_18 : f32 to vector<6x1xf32>
    %32 = arith.subf %31, %29 : vector<6x1xf32>
    %33 = math.exp %32 : vector<6x1xf32>
    %c0_19 = arith.constant 0 : index
    %c0_20 = arith.constant 0 : index
    %34 = vector.load %arg6[%c0_19, %c0_20] : memref<6x32xf32, #tpu.memory_space<vmem>>, vector<6x32xf32>
    %cst_21 = arith.constant dense<0.000000e+00> : vector<6x8xf32>
    %35 = tpu.matmul %34, %22, %cst_21 {dimension_numbers = #tpu.dot_dimension_numbers<[1], [0], [0], [1], [0, 0, 1, 1], [], []>} : vector<6x32xf32>, vector<32x8xf32>, vector<6x8xf32> -> vector<6x8xf32>
    %36 = vector.broadcast %24 : vector<6x1xf32> to vector<6x8xf32>
    %37 = arith.addf %35, %36 : vector<6x8xf32>
    %38 = math.tanh %37 : vector<6x8xf32>
    %c0_22 = arith.constant 0 : index
    %c0_23 = arith.constant 0 : index
    %39 = vector.load %arg2[%c0_22, %c0_23] : memref<6x8xf32, #tpu.memory_space<vmem>>, vector<6x8xf32>
    %40 = vector.broadcast %30 : vector<6x1xf32> to vector<6x8xf32>
    %41 = arith.mulf %40, %39 : vector<6x8xf32>
    %42 = arith.addf %38, %41 : vector<6x8xf32>
    %cst_24 = arith.constant -1.000000e+00 : f32
    %cst_25 = arith.constant 1.000000e+00 : f32
    %43 = vector.broadcast %cst_24 : f32 to vector<6x8xf32>
    %44 = arith.maximumf %43, %42 : vector<6x8xf32>
    %45 = vector.broadcast %cst_25 : f32 to vector<6x8xf32>
    %46 = arith.minimumf %45, %44 : vector<6x8xf32>
    %47 = arith.subf %46, %38 : vector<6x8xf32>
    %48 = vector.broadcast %33 : vector<6x1xf32> to vector<6x8xf32>
    %49 = arith.mulf %47, %48 : vector<6x8xf32>
    %50 = vector.shape_cast %29 : vector<6x1xf32> to vector<1x6x1xf32>
    %cst_26 = arith.constant dense<0.000000e+00> : vector<1xf32>
    %51 = vector.multi_reduction <add>, %50, %cst_26 [1, 2] : vector<1x6x1xf32> to vector<1xf32>
    %52 = vector.shape_cast %51 : vector<1xf32> to vector<1x1x1xf32>
    %53 = vector.extract %52[0, 0, 0] : f32 from vector<1x1x1xf32>
    %cst_27 = arith.constant 5.51363134 : f32
    %54 = arith.addf %53, %cst_27 : f32
    %c0_28 = arith.constant 0 : index
    %c0_29 = arith.constant 0 : index
    %55 = vector.load %arg9[%c0_28, %c0_29] : memref<6x8xf32, #tpu.memory_space<vmem>>, vector<6x8xf32>
    tpu.vector_store %arg9[%c0_28, %c0_29], %46 {strides = array<i32>} : memref<6x8xf32, #tpu.memory_space<vmem>>, vector<6x8xf32>,
    %56 = arith.mulf %49, %49 : vector<6x8xf32>
    %cst_30 = arith.constant dense<0.000000e+00> : vector<8xf32>
    %57 = vector.multi_reduction <add>, %56, %cst_30 [0] : vector<6x8xf32> to vector<8xf32>
    %58 = vector.shape_cast %57 : vector<8xf32> to vector<1x8xf32>
    %cst_31 = arith.constant -5.000000e-01 : f32
    %59 = vector.broadcast %cst_31 : f32 to vector<1x8xf32>
    %60 = arith.mulf %59, %58 : vector<1x8xf32>
    %61 = vector.broadcast %54 : f32 to vector<1x8xf32>
    %62 = arith.subf %60, %61 : vector<1x8xf32>
    %c0_32 = arith.constant 0 : index
    %c0_33 = arith.constant 0 : index
    %63 = vector.load %arg10[%c0_32, %c0_33] : memref<1x8xf32, #tpu.memory_space<vmem>>, vector<1x8xf32>
    tpu.vector_store %arg10[%c0_32, %c0_33], %62 {strides = array<i32>} : memref<1x8xf32, #tpu.memory_space<vmem>>, vector<1x8xf32>,
    return
  }
  func.func @transform_0(%arg0: i32) -> (i32, i32) {
    %c0_i32 = arith.constant 0 : i32
    %c0_i32_0 = arith.constant 0 : i32
    return %c0_i32, %arg0 : i32, i32
  }
  func.func @transform_1(%arg0: i32) -> (i32, i32) {
    %c0_i32 = arith.constant 0 : i32
    %c0_i32_0 = arith.constant 0 : i32
    return %c0_i32, %arg0 : i32, i32
  }
  func.func @transform_2(%arg0: i32) -> (i32, i32) {
    %c0_i32 = arith.constant 0 : i32
    %c0_i32_0 = arith.constant 0 : i32
    %c0_i32_1 = arith.constant 0 : i32
    return %c0_i32, %c0_i32_0 : i32, i32
  }
  func.func @transform_3(%arg0: i32) -> (i32, i32) {
    %c0_i32 = arith.constant 0 : i32
    %c0_i32_0 = arith.constant 0 : i32
    %c0_i32_1 = arith.constant 0 : i32
    return %c0_i32, %c0_i32_0 : i32, i32
  }
  func.func @transform_4(%arg0: i32) -> (i32, i32) {
    %c0_i32 = arith.constant 0 : i32
    %c0_i32_0 = arith.constant 0 : i32
    %c0_i32_1 = arith.constant 0 : i32
    return %c0_i32, %c0_i32_0 : i32, i32
  }
  func.func @transform_5(%arg0: i32) -> (i32, i32) {
    %c0_i32 = arith.constant 0 : i32
    %c0_i32_0 = arith.constant 0 : i32
    %c0_i32_1 = arith.constant 0 : i32
    return %c0_i32, %c0_i32_0 : i32, i32
  }
  func.func @transform_6(%arg0: i32) -> (i32, i32) {
    %c0_i32 = arith.constant 0 : i32
    %c0_i32_0 = arith.constant 0 : i32
    %c0_i32_1 = arith.constant 0 : i32
    return %c0_i32, %c0_i32_0 : i32, i32
  }
  func.func @transform_7(%arg0: i32) -> (i32, i32) {
    %c0_i32 = arith.constant 0 : i32
    %c0_i32_0 = arith.constant 0 : i32
    %c0_i32_1 = arith.constant 0 : i32
    return %c0_i32, %c0_i32_0 : i32, i32
  }
  func.func @transform_8(%arg0: i32) -> (i32, i32) {
    %c0_i32 = arith.constant 0 : i32
    %c0_i32_0 = arith.constant 0 : i32
    return %c0_i32, %arg0 : i32, i32
  }
  func.func @transform_9(%arg0: i32) -> (i32, i32) {
    %c0_i32 = arith.constant 0 : i32
    %c0_i32_0 = arith.constant 0 : i32
    return %c0_i32, %arg0 : i32, i32
  }
}

</mosaic_0001>

<bundles_post_ra>
// kernel: tpu_custom_call.1
= control target key start
LH: loop header
LB: loop body
LE: loop exit
PB: predicated region body
PF: predicated region fallthrough
CT: control target
= control target key end

     0   :  { %15 = vsyncpa [#allocation3], 0  ;;  %vm76_vm0 = vcmask 1043456   ;;  %vm63_vm1 = vcmask 97280   ;;  %v454_v4 = vmov 0   ;;  %s605_s0 = inlined_call_operand.vmem [shape: f32[12,8], index: 0, kind: input, shape index: {}]   ;;  %s606_s1 = inlined_call_operand.vmem [shape: f32[6,8], index: 1, kind: input, shape index: {}]   ;;  %s607_s2 = inlined_call_operand.vmem [shape: f32[32,12], index: 2, kind: input, shape index: {}]   ;;  %s608_s3 = inlined_call_operand.vmem [shape: f32[32,32], index: 3, kind: input, shape index: {}]   ;;  %s609_s4 = inlined_call_operand.vmem [shape: f32[32,32], index: 4, kind: input, shape index: {}]   ;;  %s610_s5 = inlined_call_operand.vmem [shape: f32[6,32], index: 5, kind: input, shape index: {}]   ;;  %s611_s6 = inlined_call_operand.vmem [shape: f32[32,3], index: 6, kind: input, shape index: {}]   ;;  %s612_s7 = inlined_call_operand.vmem [shape: f32[6,2], index: 7, kind: input, shape index: {}]   ;;  %s613_s8 = inlined_call_operand.hbm [shape: f32[6,8], index: 8, kind: output, shape index: {0}]   ;;  %s614_s9 = inlined_call_operand.hbm [shape: f32[1,8], index: 9, kind: output, shape index: {1}]  }
   0x1   :  { %v34_v0 = vld [vmem:[%s605_s0 + $0x8] sm:$0xf]  ;;  %v33_v1 = vld [vmem:[%s605_s0] sm:$0xff]  ;;  %386 = vset.pattern.permute.xlu1 %v454_v4  ;;  %385 = vset.pattern.permute.xlu0 %v454_v4  ;;  %v38_v5 = vld [vmem:[%s611_s6 + $0x18] sm:$0xff] }
   0x2   :  { %362 = vmatpush.msk.msra.mxu0 %vm76_vm0, %v34_v0  ;;  %v39_v2 = vld [vmem:[%s607_s2] sm:$0xff]  ;;  %v522_v3 = vld [vmem:[%s611_s6 + $0x8] sm:$0xff] }
   0x3   :  { %50 = vperm.xlu1 %386, %v522_v3  }
   0x4   :  { %95 = vmatpush.msra.mxu0 %v33_v1 }
   0x5   :  { %16 = vsyncpa [#allocation5], 0  ;;  %363 = vmatmul.msk.f32.vlgmr.msra.gmra.mxu0 %vm63_vm1, %v39_v2  ;;  %60 = vperm.xlu0 %385, %v38_v5   ;;  %v35_v6 = vld [vmem:[%s611_s6] sm:$0xff]  ;;  %v40_v7 = vld [vmem:[%s607_s2 + $0x8] sm:$0xff]  ;;  %v455_v14 = vmov 1   ;;  %vm133_vm2 = vcmask 261120  }
   0x6   :  { %v37_v8 = vld [vmem:[%s611_s6 + $0x10] sm:$0xff]  ;;  %v42_v10 = vld [vmem:[%s607_s2 + $0x18] sm:$0xff]  ;;  %387 = vset.pattern.permute.xlu2 %v455_v14  ;;  %v113_v28 = vld [vmem:[%s608_s3] sm:$0xff]  ;;  %v456_v35 = vmov 2   ;;  %s457_s16 = smov 127   ;;  %vm303_vm3 = vcmask 5120  }
   0x7   :  { %v41_v9 = vld [vmem:[%s607_s2 + $0x10] sm:$0xff]  ;;  %130 = vperm.xlu2 %387, %v38_v5   ;;  %v114_v29 = vld [vmem:[%s608_s3 + $0x8] sm:$0xff]  ;;  %v116_v31 = vld [vmem:[%s608_s3 + $0x18] sm:$0xff]  ;;  %s337_s27 = sshll.u32 %s613_s8, 4  ;;  %vm315_vm4 = vcmask 62464   ;;  %s459_s8 = smov [#allocation4]   ;;  %s338_s27 = int_to_ptr.hbm [resolvable:$true] %s337_s27 }
   0x8   :  { %v115_v30 = vld [vmem:[%s608_s3 + $0x10] sm:$0xff]  ;;  %v244_v45 = vld [vmem:[%s612_s7] sm:$0x3f]  ;;  %v180_v57 = vld [vmem:[%s609_s4 + $0x8] sm:$0xff]  ;;  %s346_s6 = sshll.u32 %s459_s8, 4  ;;  %s348_s30 = sshll.u32 %s614_s9, 4  ;;  %s347_s6 = int_to_ptr.vmem [resolvable:$true] %s346_s6  ;;  %s349_s30 = int_to_ptr.hbm [resolvable:$true] %s348_s30 }
   0x9   :  { %v245_v48 = vmax.f32 %v244_v45, -5.0  ;;  %v179_v52 = vld [vmem:[%s609_s4] sm:$0xff]  ;;  %v181_v59 = vld [vmem:[%s609_s4 + $0x10] sm:$0xff]  ;;  %v182_v60 = vld [vmem:[%s609_s4 + $0x18] sm:$0xff]  ;;  %vm328_vm5 = vcmask 57344  }
   0xb   :  { %45 = vperm.xlu1 %386, %v35_v6   ;;  %v246_v50 = vmin.f32 %v245_v48, 2.0 }
   0xd   :  { %364 = vmatmul.msk.f32.gmra.mxu0 %vm63_vm1, %v40_v7  ;;  %55 = vperm.xlu0 %385, %v37_v8   ;;  %v247_v53 = vmul.f32 1.442695, %v246_v50  ;;  %v249_v54 = vsub.f32 0.0, %v246_v50 }
   0xf   :  { %126 = vperm.xlu2 %387, %v37_v8   ;;  %396 = vpow2.f32 %v247_v53  ;;  %v250_v55 = vmul.f32 1.442695, %v249_v54 }
  0x11   :  { %398 = vpow2.f32 %v250_v55 }
  0x13   :  { %389 = vset.pattern.permute.xlu1 %v455_v14 }
  0x14   :  { %118 = vperm.xlu1 %389, %v35_v6  }
  0x15   :  { %365 = vmatmul.msk.f32.gmra.mxu0 %vm63_vm1, %v41_v9  ;;  %388 = vset.pattern.permute.xlu0 %v455_v14  ;;  %v397_v56 = vpop.eup %396 }
  0x16   :  { %122 = vperm.xlu0 %388, %v522_v3  }
  0x17   :  { %390 = vset.pattern.permute.xlu2 %v456_v35  ;;  %v399_v58 = vpop.eup %398 }
  0x18   :  { %196 = vperm.xlu2 %390, %v38_v5  }
  0x1c   :  { %391 = vset.pattern.permute.xlu1 %v456_v35 }
  0x1d   :  { %366 = vmatmul.msk.f32.gmra.mxu0 %vm63_vm1, %v42_v10  ;;  %192 = vperm.xlu1 %391, %v37_v8  }
  0x1e   :  { %392 = vset.pattern.permute.xlu0 %v456_v35 }
  0x1f   :  { %184 = vperm.xlu0 %392, %v35_v6  }
  0x20   :  { %188 = vperm.xlu2 %390, %v522_v3  }
  0x25   :  { %393 = vset.pattern.permute.xlu1 %v454_v4 }
  0x26   :  { %300 = vrot.lane.b32.xlu1 %v246_v50, %s457_s16 }
  0x27   :  { %394 = vset.pattern.permute.xlu0 %v455_v14 }
  0x28   :  { %285 = vperm.xlu0 %394, %v397_v56  }
  0x2e   :  { %255 = vperm.xlu1 %393, %v244_v45  }
  0x36   :  { %395 = vset.pattern.permute.xlu1 %v455_v14 }
  0x37   :  { %295 = vperm.xlu1 %395, %v399_v58  }
  0x61   :  { %v131_v34 = vpop.permute.xlu2 %130 }
  0x69   :  { %v127_v37 = vpop.permute.xlu2 %126 }
  0x72   :  { %v197_v2 = vpop.permute.xlu2 %196 }
  0x75   :  { %v51_v15 = vpop.permute.xlu1 %50 }
  0x77   :  { %v61_v13 = vpop.permute.xlu0 %60 }
  0x7a   :  { %v189_v4 = vpop.permute.xlu2 %188 }
  0x7d   :  { %v46_v21 = vpop.permute.xlu1 %45 }
  0x7f   :  { %v56_v17 = vpop.permute.xlu0 %55 }
  0x82   :  { %v97_v11 = vpop.f32.mrf.mxu0 }
  0x83   :  { %v98_v24 = vadd.f32 %v97_v11, %v46_v21 }
  0x85   :  { %v109_v27 = vmax.f32 %v98_v24, 0.0 }
  0x86   :  { %v119_v42 = vpop.permute.xlu1 %118 }
  0x88   :  { %v123_v38 = vpop.permute.xlu0 %122 }
  0x8a   :  { %v100_v12 = vpop.f32.mrf.mxu0 }
  0x8b   :  { %v101_v22 = vadd.f32 %v100_v12, %v51_v15  ;;  %v252_v15 = vld [vmem:[%s610_s5] sm:$0x3f]  ;;  %s458_s5 = smov [#allocation2]  }
  0x8c   :  { %s335_s24 = sshll.u32 %s458_s5, 4  ;;  %s336_s24 = int_to_ptr.vmem [resolvable:$true] %s335_s24 }
  0x8d   :  { %v110_v26 = vmax.f32 %v101_v22, 0.0 }
  0x8f   :  { %v193_v61 = vpop.permute.xlu1 %192 }
  0x91   :  { %v185_v8 = vpop.permute.xlu0 %184 }
  0x92   :  { %v103_v16 = vpop.f32.mrf.mxu0 }
  0x93   :  { %v104_v19 = vadd.f32 %v103_v16, %v56_v17 }
  0x95   :  { %v111_v25 = vmax.f32 %v104_v19, 0.0 }
  0x98   :  { %v301_v62 = vpop.permute.xlu1 %300 }
  0x99   :  { %v304_v63 = vsel %vm303_vm3, %v301_v62, 0.0 }
  0x9a   :  { %v106_v18 = vpop.f32.mrf.mxu0  ;;  %305 = vadd.xlane.f32.xlu2 %v304_v63 }
  0x9b   :  { %v107_v20 = vadd.f32 %v106_v18, %v61_v13 }
  0x9d   :  { %v112_v23 = vmax.f32 %v107_v20, 0.0 }
  0x9f   :  { %158 = vmatpush.msra.mxu1 %v112_v23 }
  0xa0   :  { %v256_v23 = vpop.permute.xlu1 %255 }
  0xa1   :  { %159 = vmatpush.msra.mxu1 %v111_v25 }
  0xa3   :  { %160 = vmatpush.msra.mxu1 %v110_v26  ;;  %v282_v26 = vld [vmem:[%s606_s1] sm:$0x3f] }
  0xa5   :  { %161 = vmatpush.msra.mxu1 %v109_v27  ;;  %v286_v27 = vpop.permute.xlu0 %285 }
  0xa6   :  { %367 = vmatmul.msk.f32.vlgmr.msra.gmra.mxu1 %vm133_vm2, %v113_v28  ;;  %v288_v28 = vmul.f32 %v286_v27, %v282_v26 }
  0xae   :  { %368 = vmatmul.msk.f32.gmra.mxu1 %vm133_vm2, %v114_v29 }
  0xb6   :  { %369 = vmatmul.msk.f32.gmra.mxu1 %vm133_vm2, %v115_v30 }
  0xbe   :  { %370 = vmatmul.msk.f32.gmra.mxu1 %vm133_vm2, %v116_v31 }
 0x10d   :  { %v306_v16 = vpop.xlane.xlu2 %305 }
 0x10e   :  { %v307_v17 = vrot.slane %v306_v16, 4 }
 0x110   :  { %v308_v18 = vadd.f32 %v307_v17, %v306_v16 }
 0x112   :  { %v309_v19 = vrot.slane %v308_v18, 2 }
 0x114   :  { %v310_v20 = vadd.f32 %v309_v19, %v308_v18 }
 0x116   :  { %v311_v21 = vrot.slane %v310_v20, 1 }
 0x118   :  { %v312_v22 = vadd.f32 %v311_v21, %v310_v20 }
 0x11a   :  { %377 = vpush %v312_v22 }
 0x123   :  { %v163_v32 = vpop.f32.mrf.mxu1 }
 0x124   :  { %v164_v46 = vadd.f32 %v163_v32, %v119_v42  ;;  %v296_v32 = vpop.permute.xlu1 %295 }
 0x126   :  { %v175_v51 = vmax.f32 %v164_v46, 0.0 }
 0x12b   :  { %v166_v33 = vpop.f32.mrf.mxu1 }
 0x12c   :  { %v167_v43 = vadd.f32 %v166_v33, %v123_v38 }
 0x12e   :  { %v176_v49 = vmax.f32 %v167_v43, 0.0 }
 0x133   :  { %v169_v36 = vpop.f32.mrf.mxu1 }
 0x134   :  { %v170_v40 = vadd.f32 %v169_v36, %v127_v37 }
 0x136   :  { %v177_v47 = vmax.f32 %v170_v40, 0.0 }
 0x13b   :  { %v172_v39 = vpop.f32.mrf.mxu1 }
 0x13c   :  { %v173_v41 = vadd.f32 %v172_v39, %v131_v34 }
 0x13e   :  { %v178_v44 = vmax.f32 %v173_v41, 0.0 }
 0x140   :  { %223 = vmatpush.msra.mxu2 %v178_v44 }
 0x142   :  { %224 = vmatpush.msra.mxu2 %v177_v47 }
 0x144   :  { %225 = vmatpush.msra.mxu2 %v176_v49 }
 0x146   :  { %226 = vmatpush.msra.mxu2 %v175_v51 }
 0x147   :  { %371 = vmatmul.msk.f32.vlgmr.msra.gmra.mxu2 %vm133_vm2, %v179_v52 }
 0x14b   :  { %s378_s1 = spop %377 }
 0x14c   :  { %s314_s2 = sadd.f32 5.5136313, %s378_s1 }
 0x14e   :  { %v326_v44 = vstv %s314_s2 }
 0x14f   :  { %372 = vmatmul.msk.f32.gmra.mxu2 %vm133_vm2, %v180_v57 }
 0x157   :  { %373 = vmatmul.msk.f32.gmra.mxu2 %vm133_vm2, %v181_v59 }
 0x15f   :  { %374 = vmatmul.msk.f32.gmra.mxu2 %vm133_vm2, %v182_v60 }
 0x1ca   :  { %v228_v0 = vpop.f32.mrf.mxu2 }
 0x1cb   :  { %v229_v11 = vadd.f32 %v228_v0, %v185_v8 }
 0x1cd   :  { %v240_v14 = vmax.f32 %v229_v11, 0.0 }
 0x1d2   :  { %v231_v1 = vpop.f32.mrf.mxu2 }
 0x1d3   :  { %v232_v9 = vadd.f32 %v231_v1, %v189_v4 }
 0x1d5   :  { %v241_v13 = vmax.f32 %v232_v9, 0.0 }
 0x1da   :  { %v234_v3 = vpop.f32.mrf.mxu2 }
 0x1db   :  { %v235_v6 = vadd.f32 %v234_v3, %v193_v61 }
 0x1dd   :  { %v242_v12 = vmax.f32 %v235_v6, 0.0 }
 0x1e2   :  { %v237_v5 = vpop.f32.mrf.mxu2 }
 0x1e3   :  { %v238_v7 = vadd.f32 %v237_v5, %v197_v2 }
 0x1e5   :  { %v243_v10 = vmax.f32 %v238_v7, 0.0 }
 0x1e7   :  { %273 = vmatpush.msra.mxu3 %v243_v10 }
 0x1e9   :  { %274 = vmatpush.msra.mxu3 %v242_v12 }
 0x1eb   :  { %275 = vmatpush.msra.mxu3 %v241_v13 }
 0x1ed   :  { %276 = vmatpush.msra.mxu3 %v240_v14 }
 0x1ee   :  { %375 = vmatmul.msk.f32.vlgmr.msra.gmra.mxu3 %vm133_vm2, %v252_v15 }
 0x271   :  { %v278_v24 = vpop.f32.mrf.mxu3 }
 0x272   :  { %v279_v25 = vadd.f32 %v278_v24, %v256_v23 }
 0x274   :  { %400 = vtanh.f32 %v279_v25 }
 0x27a   :  { %v401_v29 = vpop.eup %400 }
 0x27b   :  { %v289_v30 = vadd.f32 %v401_v29, %v288_v28 }
 0x27d   :  { %v376_v31 = vclamps-f32 %v289_v30, 1.0 }
 0x27f   :  { %v292_v33 = vsub.f32 %v376_v31, %v401_v29  ;;  %316 = vst.msk [vmem:[#allocation2] sm:$0x3f] %vm315_vm4, %v376_v31 }
 0x280   :  { %340 = dma.vmem_to_hbm [thread:$0]  %s336_s24, 128, %s338_s27, [#allocation3]  }
 0x281   :  { %v298_v34 = vmul.f32 %v296_v32, %v292_v33 }
 0x283   :  { %v317_v35 = vmul.f32 %v298_v34, %v298_v34 }
 0x285   :  { %v318_v36 = vsel %vm315_vm4, %v317_v35, 0.0 }
 0x286   :  { %v319_v37 = vrot.slane %v318_v36, 4 }
 0x288   :  { %v320_v38 = vadd.f32 %v319_v37, %v318_v36 }
 0x28a   :  { %v321_v39 = vrot.slane %v320_v38, 2 }
 0x28c   :  { %v322_v40 = vadd.f32 %v321_v39, %v320_v38 }
 0x28e   :  { %v323_v41 = vrot.slane %v322_v40, 1 }
 0x290   :  { %v324_v42 = vadd.f32 %v323_v41, %v322_v40 }
 0x292   :  { %v325_v43 = vmul.f32 -0.5, %v324_v42 }
 0x294   :  { %v327_v45 = vsub.f32 %v325_v43, %v326_v44 }
 0x296   :  { %329 = vst.msk [vmem:[#allocation4] sm:$0x1] %vm328_vm5, %v327_v45 }
 0x297   :  { %351 = dma.vmem_to_hbm [thread:$0]  %s347_s6, 16, %s349_s30, [#allocation5]  }
 0x298   :  { %450 = dma.done.wait [#allocation3], 128  }
 0x299   :  { %451 = vsyncadd [#allocation3], 4294967168 }
 0x29a   :  { %452 = dma.done.wait [#allocation5], 16  }
 0x29b   :  { %453 = vsyncadd [#allocation5], 4294967280 }
 0x29c   :  { %360 = vsyncpa [#allocation3], 1 }
 0x29d   :  { %361 = vsyncpa [#allocation5], 1 }

</bundles_post_ra>
